<compile_context>
chip_gen: v5e
topology: v5e:2x2
jax: 0.10.0
libtpu: 0.0.40
codegen_flags: <defaults>
</compile_context>

<pallas_src>
import math

import jax
import jax.numpy as jnp
from jax import lax
from jax.experimental import pallas as pl
from jax.experimental.pallas import tpu as pltpu


def _sinusoidal_table(d_pe, max_len, dtype=jnp.float32):
    """Standard sinusoidal positional-encoding table, shape (max_len, d_pe)."""
    position = jnp.arange(max_len, dtype=jnp.float32)[:, None]
    div_term = jnp.exp(
        jnp.arange(0, d_pe, 2, dtype=jnp.float32) * (-math.log(10000.0) / d_pe)
    )
    ang = position * div_term                                   # (max_len, d_pe//2)
    pe = jnp.zeros((max_len, d_pe), jnp.float32)
    pe = pe.at[:, 0::2].set(jnp.sin(ang))
    pe = pe.at[:, 1::2].set(jnp.cos(ang))
    return pe.astype(dtype)


def _cdiv(a, b):
    return -(-a // b)


def _round_up(n, m):
    return _cdiv(n, m) * m


def _tree_pe_kernel_add(par_ref, x_ref, pepos_ref, pe_ref, o_ref, acc_ref):
    # out = x + PE[pos] + PE[par]; PE[pos] is streamed (no gather), PE[par] is a one-hot matmul.
    k = pl.program_id(1)

    @pl.when(k == 0)
    def _():
        acc_ref[...] = jnp.zeros_like(acc_ref)

    tk = pe_ref.shape[0]
    pe_chunk = pe_ref[...]                                            # (tk, D)
    # (1, tk) iota broadcast against (tm, 1) indices -> no (tm, tk) iota materialized.
    col = k * tk + lax.broadcasted_iota(jnp.int32, (1, tk), 1)
    oh_par = (par_ref[...] == col).astype(pe_chunk.dtype)             # (tm, tk)
    acc_ref[...] += jnp.dot(oh_par, pe_chunk, preferred_element_type=jnp.float32)

    @pl.when(k == pl.num_programs(1) - 1)
    def _():
        o_ref[...] = (x_ref[...].astype(jnp.float32)
                      + pepos_ref[...].astype(jnp.float32)
                      + acc_ref[...]).astype(o_ref.dtype)


def _tree_pe_kernel_concat(par_ref, x_ref, pepos_ref, pe_ref, o_ref, acc_ref):
    # out[:, :D/2] = x[:, :D/2] + PE[pos];  out[:, D/2:] = x[:, D/2:] + PE[par]
    k = pl.program_id(1)

    @pl.when(k == 0)
    def _():
        acc_ref[...] = jnp.zeros_like(acc_ref)

    tk = pe_ref.shape[0]
    d_half = pe_ref.shape[1]
    pe_chunk = pe_ref[...]                                            # (tk, D//2)
    col = k * tk + lax.broadcasted_iota(jnp.int32, (1, tk), 1)
    oh_par = (par_ref[...] == col).astype(pe_chunk.dtype)             # (tm, tk)
    acc_ref[...] += jnp.dot(oh_par, pe_chunk, preferred_element_type=jnp.float32)

    @pl.when(k == pl.num_programs(1) - 1)
    def _():
        # First half needs no gather: PE[:L] rows are streamed pre-tiled per row block.
        o_ref[:, :d_half] = (x_ref[:, :d_half].astype(jnp.float32)
                             + pepos_ref[...].astype(jnp.float32)).astype(o_ref.dtype)
        # Second half: accumulated parent gather.  Lane-dense when d_half % 128 == 0
        # (typical d_model >= 256); otherwise a masked store on a tiny epilogue.
        o_ref[:, d_half:] = (x_ref[:, d_half:].astype(jnp.float32)
                             + acc_ref[...]).astype(o_ref.dtype)


def tree_positional_encoding(x, parents, pe_table, *, concat=False,
                             block_rows=512, block_k=512,
                             pe_compute_dtype=jnp.bfloat16):
    """x: (B, L, D); parents: (B, L) int indices into pe_table; pe_table: (max_len, d_pe)."""
    B, L, D = x.shape
    max_len, d_pe = pe_table.shape
    if concat:
        assert D % 2 == 0 and d_pe == D // 2, "concat=True expects a d_model//2-wide PE table"
    else:
        assert d_pe == D, "concat=False expects a d_model-wide PE table"
    assert L <= max_len, "sequence length exceeds PE table max_len"

    rows = B * L
    x2 = x.reshape(rows, D)
    par = parents.reshape(rows).astype(jnp.int32)
    # Torch-style negative indexing (e.g. root sentinel -1 -> last PE row).
    par = jnp.where(par < 0, par + max_len, par).reshape(rows, 1)

    pe = pe_table.astype(pe_compute_dtype)
    # PE[pos] term: positions are the contiguous range 0..L-1 -> no gather needed.
    # Pre-tile wrapper-side to (rows, d_pe) and stream it per row block.
    pe_pos = jnp.tile(pe[:L], (B, 1))                                 # (rows, d_pe)

    # ---- Row tiling: batch-fused, balanced, capped for VMEM, >= 2 blocks for megacore. ----
    max_tm_vmem = max(8, ((4 << 20) // max(1, D * 4)) // 8 * 8)      # keep x tile ~<= 4 MiB
    block_rows_eff = max(8, min(block_rows, max_tm_vmem))
    nb = _cdiv(rows, block_rows_eff)
    if rows > 64:
        nb = max(nb, 2)                       # keep v7x's second TensorCore busy
    tm = max(8, _round_up(_cdiv(rows, nb), 8))
    rows_p = _round_up(rows, tm)
    if rows_p != rows:
        pad = rows_p - rows
        x2 = jnp.pad(x2, ((0, pad), (0, 0)))
        par = jnp.pad(par, ((0, pad), (0, 0)))
        pe_pos = jnp.pad(pe_pos, ((0, pad), (0, 0)))

    # ---- Balanced K tiling over PE rows (zero-padded rows are never selected). ----
    nk = _cdiv(max_len, block_k)
    tk = max(8, _round_up(_cdiv(max_len, nk), 8))
    nk = _cdiv(max_len, tk)
    ml_p = nk * tk
    if ml_p != max_len:
        pe = jnp.pad(pe, ((0, ml_p - max_len), (0, 0)))

    grid = (rows_p // tm, nk)
    kernel = _tree_pe_kernel_concat if concat else _tree_pe_kernel_add

    # Explicit VMEM budget (double-buffered inputs/outputs + f32 accumulator + one-hot temps),
    # kept within v5e's small default scoped VMEM and v7x's 64 MiB physical VMEM.
    bytes_x = jnp.dtype(x.dtype).itemsize
    bytes_pe = jnp.dtype(pe_compute_dtype).itemsize
    est = (2 * tm * 128 * 4                 # parent indices (lane-padded)
           + 2 * tm * D * bytes_x           # x
           + 2 * tm * d_pe * bytes_pe       # streamed PE[pos] rows
           + 2 * tk * d_pe * bytes_pe       # streamed PE chunk
           + 2 * tm * D * bytes_x           # out
           + tm * d_pe * 4                  # f32 accumulator
           + 2 * tm * tk * max(bytes_pe, 4))  # one-hot + temporaries headroom
    vmem_limit = int(min(64 << 20, max(32 << 20, 2 * est)))

    out = pl.pallas_call(
        kernel,
        out_shape=jax.ShapeDtypeStruct((rows_p, D), x.dtype),
        grid=grid,
        in_specs=[
            pl.BlockSpec((tm, 1), lambda m, k: (m, 0)),       # parent indices, per row block
            pl.BlockSpec((tm, D), lambda m, k: (m, 0)),       # x rows (fetched once per m)
            pl.BlockSpec((tm, d_pe), lambda m, k: (m, 0)),    # PE[pos] rows (pre-tiled)
            pl.BlockSpec((tk, d_pe), lambda m, k: (k, 0)),    # streamed PE chunk (K axis)
        ],
        out_specs=pl.BlockSpec((tm, D), lambda m, k: (m, 0)),
        scratch_shapes=[pltpu.VMEM((tm, d_pe), jnp.float32)],
        compiler_params=pltpu.CompilerParams(
            dimension_semantics=("parallel", "arbitrary"),
            vmem_limit_bytes=vmem_limit),
    )(par, x2, pe_pos, pe)

    return out[:rows].reshape(B, L, D)


if __name__ == "__main__":
    B, L, D, MAX_LEN = 2, 8, 32, 16

    key = jax.random.PRNGKey(0)
    kx, kp = jax.random.split(key)
    x = jax.random.normal(kx, (B, L, D), jnp.float32)
    parents = jax.random.randint(kp, (B, L), 0, L, dtype=jnp.int32)

    # --- concat=False, f32 PE path (bit-parity with the reference) ---
    pe_full = _sinusoidal_table(D, MAX_LEN)
    out_f32 = jax.block_until_ready(
        tree_positional_encoding(x, parents, pe_full, concat=False,
                                 pe_compute_dtype=jnp.float32)
    )
    ref = x + pe_full[:L][None] + pe_full[parents]
    assert out_f32.shape == (B, L, D) and out_f32.dtype == jnp.float32
    assert jnp.allclose(out_f32, ref, atol=1e-5, rtol=1e-5), "concat=False f32 mismatch"

    # --- concat=False, default bf16 PE compute ---
    out = jax.block_until_ready(
        tree_positional_encoding(x, parents, pe_full, concat=False)
    )
    assert jnp.allclose(out, ref, atol=2e-2, rtol=2e-2), "concat=False bf16 mismatch"

    # --- concat=True path (x + cat([pe.get(L).expand(B,-1,-1), pe.index(parents)], dim=2)) ---
    pe_half = _sinusoidal_table(D // 2, MAX_LEN)
    out_c = jax.block_until_ready(
        tree_positional_encoding(x, parents, pe_half, concat=True)
    )
    ref_c = x + jnp.concatenate(
        [jnp.broadcast_to(pe_half[:L][None], (B, L, D // 2)), pe_half[parents]],
        axis=2,
    )
    assert jnp.allclose(out_c, ref_c, atol=2e-2, rtol=2e-2), "concat=True mismatch"

    # --- larger check: row padding, >=2 row blocks, balanced K chunks, negative parents ---
    B2, L2, ML2 = 4, 24, 1040
    kx2, kp2 = jax.random.split(jax.random.PRNGKey(1))
    x2 = jax.random.normal(kx2, (B2, L2, D), jnp.float32)
    par2 = jax.random.randint(kp2, (B2, L2), 0, ML2, dtype=jnp.int32)
    par2 = par2.at[:, 0].set(-1)                       # root sentinel -> wraps to last PE row
    pe2 = _sinusoidal_table(D, ML2)
    out2 = jax.block_until_ready(
        tree_positional_encoding(x2, par2, pe2, concat=False,
                                 block_rows=64, block_k=512)
    )
    par2_wrapped = jnp.where(par2 < 0, par2 + ML2, par2)
    ref2 = x2 + pe2[:L2][None] + pe2[par2_wrapped]
    assert jnp.allclose(out2, ref2, atol=2e-2, rtol=2e-2), "K-tiled / negative-index mismatch"

    print("KERNEL_OK")
</pallas_src>

<mosaic_0001>
module attributes {stable_mosaic.version = 11 : i64} {
  func.func @_tree_pe_kernel_add(%arg0: i32, %arg1: i32, %arg2: memref<16x1xi32, #tpu.memory_space<vmem>>, %arg3: memref<16x32xf32, #tpu.memory_space<vmem>>, %arg4: memref<16x32xf32, #tpu.memory_space<vmem>>, %arg5: memref<16x32xf32, #tpu.memory_space<vmem>>, %arg6: memref<16x32xf32, #tpu.memory_space<vmem>>, %arg7: memref<16x32xf32, #tpu.memory_space<vmem>>) attributes {dimension_semantics = [#tpu.dimension_semantics<parallel>, #tpu.dimension_semantics<arbitrary>], iteration_bounds = array<i64: 1, 1>, scalar_prefetch = 0 : i64, scratch_operands = 1 : i64, tpu.core_type = #tpu.core_type<tc>, window_params = [{transform_indices = @transform_0, window_bounds = array<i64: 16, 1>}, {transform_indices = @transform_1, window_bounds = array<i64: 16, 32>}, {transform_indices = @transform_2, window_bounds = array<i64: 16, 32>}, {transform_indices = @transform_3, window_bounds = array<i64: 16, 32>}, {transform_indices = @transform_4, window_bounds = array<i64: 16, 32>}]} {
    %c0_i32 = arith.constant 0 : i32
    %0 = arith.cmpi eq, %arg1, %c0_i32 : i32
    %1 = arith.extui %0 : i1 to i32
    %c0_i32_0 = arith.constant 0 : i32
    %2 = arith.cmpi ne, %1, %c0_i32_0 : i32
    scf.if %2 {
      %cst_10 = arith.constant 0.000000e+00 : f32
      %21 = vector.broadcast %cst_10 : f32 to vector<16x32xf32>
      %c0_11 = arith.constant 0 : index
      %c0_12 = arith.constant 0 : index
      %22 = vector.load %arg7[%c0_11, %c0_12] : memref<16x32xf32, #tpu.memory_space<vmem>>, vector<16x32xf32>
      tpu.vector_store %arg7[%c0_11, %c0_12], %21 {strides = array<i32>} : memref<16x32xf32, #tpu.memory_space<vmem>>, vector<16x32xf32>,
    } else {
    }
    %c0 = arith.constant 0 : index
    %c0_1 = arith.constant 0 : index
    %3 = vector.load %arg5[%c0, %c0_1] : memref<16x32xf32, #tpu.memory_space<vmem>>, vector<16x32xf32>
    %c16_i32 = arith.constant 16 : i32
    %4 = arith.muli %arg1, %c16_i32 : i32
    %5 = tpu.iota {dimensions = array<i32: 1>} : vector<1x16xi32>
    %6 = vector.broadcast %4 : i32 to vector<1x16xi32>
    %7 = arith.addi %6, %5 : vector<1x16xi32>
    %c0_2 = arith.constant 0 : index
    %c0_3 = arith.constant 0 : index
    %8 = vector.load %arg2[%c0_2, %c0_3] : memref<16x1xi32, #tpu.memory_space<vmem>>, vector<16x1xi32>
    %9 = vector.broadcast %8 : vector<16x1xi32> to vector<16x16xi32>
    %10 = vector.broadcast %7 : vector<1x16xi32> to vector<16x16xi32>
    %11 = arith.cmpi eq, %9, %10 : vector<16x16xi32>
    %12 = arith.extui %11 : vector<16x16xi1> to vector<16x16xi32>
    %13 = arith.sitofp %12 : vector<16x16xi32> to vector<16x16xf32>
    %c0_4 = arith.constant 0 : index
    %c0_5 = arith.constant 0 : index
    %14 = vector.load %arg7[%c0_4, %c0_5] : memref<16x32xf32, #tpu.memory_space<vmem>>, vector<16x32xf32>
    %cst = arith.constant dense<0.000000e+00> : vector<16x32xf32>
    %15 = tpu.matmul %13, %3, %cst {dimension_numbers = #tpu.dot_dimension_numbers<[1], [0], [0], [1], [0, 0, 1, 1], [], []>} : vector<16x16xf32>, vector<16x32xf32>, vector<16x32xf32> -> vector<16x32xf32>
    %16 = arith.addf %14, %15 : vector<16x32xf32>
    %c0_6 = arith.constant 0 : index
    %c0_7 = arith.constant 0 : index
    %17 = vector.load %arg7[%c0_6, %c0_7] : memref<16x32xf32, #tpu.memory_space<vmem>>, vector<16x32xf32>
    tpu.vector_store %arg7[%c0_6, %c0_7], %16 {strides = array<i32>} : memref<16x32xf32, #tpu.memory_space<vmem>>, vector<16x32xf32>,
    %c0_i32_8 = arith.constant 0 : i32
    %18 = arith.cmpi eq, %arg1, %c0_i32_8 : i32
    %19 = arith.extui %18 : i1 to i32
    %c0_i32_9 = arith.constant 0 : i32
    %20 = arith.cmpi ne, %19, %c0_i32_9 : i32
    scf.if %20 {
      %c0_10 = arith.constant 0 : index
      %c0_11 = arith.constant 0 : index
      %21 = vector.load %arg3[%c0_10, %c0_11] : memref<16x32xf32, #tpu.memory_space<vmem>>, vector<16x32xf32>
      %c0_12 = arith.constant 0 : index
      %c0_13 = arith.constant 0 : index
      %22 = vector.load %arg4[%c0_12, %c0_13] : memref<16x32xf32, #tpu.memory_space<vmem>>, vector<16x32xf32>
      %23 = arith.addf %21, %22 : vector<16x32xf32>
      %c0_14 = arith.constant 0 : index
      %c0_15 = arith.constant 0 : index
      %24 = vector.load %arg7[%c0_14, %c0_15] : memref<16x32xf32, #tpu.memory_space<vmem>>, vector<16x32xf32>
      %25 = arith.addf %23, %24 : vector<16x32xf32>
      %c0_16 = arith.constant 0 : index
      %c0_17 = arith.constant 0 : index
      %26 = vector.load %arg6[%c0_16, %c0_17] : memref<16x32xf32, #tpu.memory_space<vmem>>, vector<16x32xf32>
      tpu.vector_store %arg6[%c0_16, %c0_17], %25 {strides = array<i32>} : memref<16x32xf32, #tpu.memory_space<vmem>>, vector<16x32xf32>,
    } else {
    }
    return
  }
  func.func @transform_0(%arg0: i32, %arg1: i32) -> (i32, i32) {
    %c0_i32 = arith.constant 0 : i32
    %c0_i32_0 = arith.constant 0 : i32
    return %arg0, %c0_i32 : i32, i32
  }
  func.func @transform_1(%arg0: i32, %arg1: i32) -> (i32, i32) {
    %c0_i32 = arith.constant 0 : i32
    %c0_i32_0 = arith.constant 0 : i32
    return %arg0, %c0_i32 : i32, i32
  }
  func.func @transform_2(%arg0: i32, %arg1: i32) -> (i32, i32) {
    %c0_i32 = arith.constant 0 : i32
    %c0_i32_0 = arith.constant 0 : i32
    return %arg0, %c0_i32 : i32, i32
  }
  func.func @transform_3(%arg0: i32, %arg1: i32) -> (i32, i32) {
    %c0_i32 = arith.constant 0 : i32
    %c0_i32_0 = arith.constant 0 : i32
    return %arg1, %c0_i32 : i32, i32
  }
  func.func @transform_4(%arg0: i32, %arg1: i32) -> (i32, i32) {
    %c0_i32 = arith.constant 0 : i32
    %c0_i32_0 = arith.constant 0 : i32
    return %arg0, %c0_i32 : i32, i32
  }
}

</mosaic_0001>

<bundles_post_ra>
// kernel: tpu_custom_call.1
= control target key start
LH: loop header
LB: loop body
LE: loop exit
PB: predicated region body
PF: predicated region fallthrough
CT: control target
= control target key end

     0   :  { %9 = vsyncpa [#allocation4], 0  ;;  %s310_s0 = inlined_call_operand.vmem [shape: s32[16,1], index: 0, kind: input, shape index: {}]   ;;  %s311_s1 = inlined_call_operand.vmem [shape: f32[16,32], index: 1, kind: input, shape index: {}]   ;;  %s312_s2 = inlined_call_operand.hbm [shape: f32[16,32], index: 2, kind: input, shape index: {}]   ;;  %s313_s3 = inlined_call_operand.hbm [shape: f32[16,32], index: 3, kind: input, shape index: {}]   ;;  %s314_s4 = inlined_call_operand.hbm [shape: f32[16,32], index: 4, kind: output, shape index: {}]  }
   0x1   :  { %10 = vsyncpa [#allocation7], 0 }
   0x2   :  { %11 = vsyncpa [#allocation5], 0  ;;  %s20_s17 = sshll.u32 %s312_s2, 4  ;;  %s242_s18 = smov [#allocation3]   ;;  %s21_s17 = int_to_ptr.hbm [resolvable:$true] %s20_s17 }
   0x3   :  { %s22_s19 = sshll.u32 %s242_s18, 4  ;;  %s33_s22 = sshll.u32 %s313_s3, 4  ;;  %s23_s19 = int_to_ptr.vmem [resolvable:$true] %s22_s19  ;;  %s34_s22 = int_to_ptr.hbm [resolvable:$true] %s33_s22 }
   0x4   :  { %s243_s23 = smov 128   ;;  %s244_s24 = smov 8  }
   0x5   :  { %28 = dma.hbm_to_vmem [thread:$0]  %s21_s17, 256, %s23_s19, [#allocation4], %s243_s23, %s243_s23, %s244_s24  }
   0x6   :  { %s245_s25 = smov [#allocation6]  }
   0x7   :  { %s35_s26 = sshll.u32 %s245_s25, 4  ;;  %s36_s26 = int_to_ptr.vmem [resolvable:$true] %s35_s26 }
   0x8   :  { %41 = dma.hbm_to_vmem [thread:$0]  %s34_s22, 256, %s36_s26, [#allocation7], %s243_s23, %s243_s23, %s244_s24  }
   0x9   :  { %236 = dma.done.wait [#allocation4], 256  }
   0xa   :  { %237 = vsyncadd [#allocation4], 4294967040 }
   0xb   :  { %238 = dma.done.wait [#allocation7], 256  }
   0xc   :  { %239 = vsyncadd [#allocation7], 4294967040  ;;  %vm54_vm0 = vcmask 261120   ;;  %v246_v0 = vmov 0   ;;  %v247_v1 = vmov 0.0   ;;  %v64_v2 = vld [vmem:[%s310_s0] sm:$0xff]  ;;  %v60_v6 = vlaneseq }
   0xd   :  { %163 = vset.pattern.permute.xlu0 %v246_v0  ;;  %55 = vst.msk [vmem:[#allocation2] sm:$0xff] %vm54_vm0, %v247_v1  ;;  %v65_v3 = vld [vmem:[%s310_s0 + $0x8] sm:$0xff]  ;;  %v57_v5 = vld [vmem:[#allocation6] sm:$0xff]  ;;  %vm80_vm1 = vcmask 130048   ;;  %v120_v16 = vld [vmem:[#allocation3] sm:$0xff]  ;;  %s248_s6 = smov [#allocation8]  }
   0xe   :  { %56 = vst.msk [vmem:[#allocation2 + $0x8] sm:$0xff] %vm54_vm0, %v247_v1  ;;  %67 = vperm.xlu0 %163, %v64_v2   ;;  %v58_v4 = vld [vmem:[#allocation6 + $0x8] sm:$0xff]  ;;  %v61_v7 = vand.u32 127, %v60_v6  ;;  %v118_v15 = vld [vmem:[%s311_s1] sm:$0xff]  ;;  %v121_v24 = vld [vmem:[#allocation3 + $0x8] sm:$0xff]  ;;  %s134_s7 = sshll.u32 %s248_s6, 4  ;;  %s135_s7 = int_to_ptr.vmem [resolvable:$true] %s134_s7 }
   0xf   :  { %101 = vmatpush.msra.mxu0 %v58_v4  ;;  %154 = vmatpush.msra.mxu1 %v58_v4  ;;  %v122_v18 = vadd.f32 %v120_v16, %v118_v15  ;;  %v119_v23 = vld [vmem:[%s311_s1 + $0x8] sm:$0xff]  ;;  %s136_s10 = sshll.u32 %s314_s4, 4  ;;  %s137_s10 = int_to_ptr.hbm [resolvable:$true] %s136_s10 }
  0x10   :  { %v123_v25 = vadd.f32 %v121_v24, %v119_v23 }
  0x11   :  { %102 = vmatpush.msra.mxu0 %v57_v5  ;;  %155 = vmatpush.msra.mxu1 %v57_v5 }
  0x14   :  { %v78_v12 = vld [vmem:[#allocation2] sm:$0xff] }
  0x15   :  { %v79_v17 = vld [vmem:[#allocation2 + $0x8] sm:$0xff] }
  0x16   :  { %70 = vperm.xlu0 %163, %v65_v3  }
  0x80   :  { %v68_v8 = vpop.permute.xlu0 %67 }
  0x81   :  { %vm72_vm2 = vcmp.eq.s32.totalorder %v68_v8, %v61_v7 }
  0x82   :  { %v150_v9 = vsel %vm72_vm2, 1.0, %v247_v1 }
  0x83   :  { %152 = vmatmul.msk.f32.vlgmr.msra.gmra.mxu0 %vm80_vm1, %v150_v9 }
  0x88   :  { %v71_v10 = vpop.permute.xlu0 %70 }
  0x89   :  { %vm73_vm3 = vcmp.eq.s32.totalorder %v71_v10, %v61_v7 }
  0x8a   :  { %v151_v11 = vsel %vm73_vm3, 1.0, %v247_v1 }
  0x8b   :  { %153 = vmatmul.msk.f32.vlgmr.msra.gmra.mxu1 %vm80_vm1, %v151_v11 }
 0x100   :  { %v104_v13 = vpop.f32.mrf.mxu0 }
 0x101   :  { %v110_v14 = vadd.f32 %v104_v13, %v78_v12 }
 0x103   :  { %113 = vst.msk [vmem:[#allocation2] sm:$0xff] %vm54_vm0, %v110_v14 }
 0x108   :  { %v107_v19 = vpop.f32.mrf.mxu1 }
 0x109   :  { %v111_v20 = vadd.f32 %v107_v19, %v79_v17 }
 0x10a   :  { %v124_v21 = vld [vmem:[#allocation2] sm:$0xff] }
 0x10b   :  { %114 = vst.msk [vmem:[#allocation2 + $0x8] sm:$0xff] %vm54_vm0, %v111_v20  ;;  %v126_v22 = vadd.f32 %v124_v21, %v122_v18 }
 0x10d   :  { %128 = vst.msk [vmem:[#allocation8] sm:$0xff] %vm54_vm0, %v126_v22 }
 0x112   :  { %v125_v26 = vld [vmem:[#allocation2 + $0x8] sm:$0xff] }
 0x113   :  { %v127_v27 = vadd.f32 %v125_v26, %v123_v25 }
 0x115   :  { %129 = vst.msk [vmem:[#allocation8 + $0x8] sm:$0xff] %vm54_vm0, %v127_v27 }
 0x116   :  { %142 = dma.vmem_to_hbm [thread:$0]  %s135_s7, 256, %s137_s10, [#allocation5], %s243_s23, %s243_s23, %s244_s24  }
 0x117   :  { %240 = dma.done.wait [#allocation5], 256  }
 0x118   :  { %241 = vsyncadd [#allocation5], 4294967040 }
 0x119   :  { %147 = vsyncpa [#allocation4], 1 }
 0x11a   :  { %148 = vsyncpa [#allocation7], 1 }
 0x11b   :  { %149 = vsyncpa [#allocation5], 1 }

</bundles_post_ra>
